<compile_context>
chip_gen: v6e
topology: v6e:2x2x1
jax: 0.10.0
libtpu: 0.0.40
codegen_flags: <defaults>
</compile_context>

<pallas_src>
import functools

import numpy as np
import jax
import jax.numpy as jnp
from jax import lax
from jax.experimental import pallas as pl
from jax.experimental.pallas import tpu as pltpu


def _dice_stats_kernel(x_ref, y_ref, out_ref, acc_ref, *,
                       C, S, ROWS, CH, gamma, apply_softmax, need_mask):
    """Grid: (B parallel, row-tiles arbitrary).
      x_ref  : (1, C, ROWS, 128) logits (native dtype)
      y_ref  : (1, 1, ROWS, 128) int32 labels (-1 marks padding)
      out_ref: (1, 4, C) float32 [intersect, sum_pred, sum_gt, fn+fp]
      acc_ref: (4, C, 128) float32 VMEM lane-partial accumulators
    """
    t = pl.program_id(1)

    @pl.when(t == 0)
    def _():
        acc_ref[...] = jnp.zeros_like(acc_ref)

    def chunk_stats(start, ch, carry):
        inter, spred, sgt, fnfp = carry
        xb = x_ref[0, :, pl.ds(start, ch), :].astype(jnp.float32)   # (C, ch, 128)
        yb = y_ref[0, 0, pl.ds(start, ch), :]                        # (ch, 128) i32

        if apply_softmax:
            m = jnp.max(xb, axis=0)                                  # (ch, 128)
            e = jnp.exp(xb - m[None])
            den = jnp.sum(e, axis=0)
            inv = pl.reciprocal(den, approx=True)
            inv = inv * (2.0 - den * inv)        # one Newton step (EUP + 2 VALU)
            p = e * inv[None]
        else:
            p = xb

        if need_mask:
            # only traced when spatial padding / a partial last tile exists
            row = lax.broadcasted_iota(jnp.int32, (ch, 128), 0)
            lane = lax.broadcasted_iota(jnp.int32, (ch, 128), 1)
            flat = (t * ROWS + start + row) * 128 + lane
            valid = flat < S
            p = jnp.where(valid[None], p, 0.0)
            yb = jnp.where(valid, yb, -1)

        # one-hot built on the fly (the "memory efficient" part of the module)
        ohf = jnp.stack([(yb == c).astype(jnp.float32) for c in range(C)],
                        axis=0)                                      # (C, ch, 128)
        prod = p * ohf                                               # intersect term
        # fn_t = ohf*(1-p) and fp_t = (1-ohf)*p are elementwise disjoint
        # (fn_t*fp_t == 0), and only fn + fp enters the loss, so
        # fn_t**g + fp_t**g == (fn_t + fp_t)**g for gamma > 0.  Accumulate fused.
        tsum = (ohf - prod) + (p - prod)          # == fn_t + fp_t
        if gamma == 2.0:
            tg = tsum * tsum
        elif gamma == 1.0:
            tg = tsum
        else:
            # TODO(synk): non-integer gamma on negative bases (apply_softmax=False
            #             with raw logits) yields NaN, exactly like the PyTorch op;
            #             gamma <= 0 is not supported by the fused fn+fp form.
            tg = tsum ** gamma

        return (inter + jnp.sum(prod, axis=1),      # (C, 128) lane partials
                spred + jnp.sum(p, axis=1),
                sgt + jnp.sum(ohf, axis=1),
                fnfp + jnp.sum(tg, axis=1))

    carry = tuple(jnp.zeros((C, 128), jnp.float32) for _ in range(4))
    n_chunks, rem = ROWS // CH, ROWS % CH
    if n_chunks > 0:
        carry = lax.fori_loop(
            0, n_chunks,
            lambda i, c: chunk_stats(pl.multiple_of(i * CH, CH), CH, c),
            carry, unroll=2)
    if rem:
        carry = chunk_stats(n_chunks * CH, rem, carry)

    for i, part in enumerate(carry):
        acc_ref[i] += part

    @pl.when(t == pl.num_programs(1) - 1)
    def _():
        out_ref[0] = jnp.sum(acc_ref[...], axis=-1)   # (4, C)


def memory_efficient_soft_dice_plus_loss(x, y, *, smooth=1.0, gamma=2.0,
                                         apply_softmax=True,
                                         block_bytes=4 * 1024 * 1024):
    """Forward pass of MemoryEfficientSoftDicePlusLoss (defaults: batch_dice=False,
    do_bg=True, loss_mask=None).  x: (B, C, *spatial) logits in any float dtype,
    y: (B, *spatial) or (B, 1, *spatial) integer class labels."""
    B, C = x.shape[0], x.shape[1]
    spatial = x.shape[2:]
    S = int(np.prod(spatial))

    # Keep x in its native dtype in HBM (bf16 stays bf16); cast inside the kernel.
    x3 = x.reshape(B, C, S)
    if y.ndim == x.ndim:                       # (B, 1, *spatial) label map
        y = y.reshape((B,) + spatial)
    # TODO(synk): labels could be shipped as int8 to shave ~15% HBM traffic for
    #             small C; kept int32 since sub-word sublane slicing inside the
    #             chunk loop is the riskier lowering path.
    y3 = y.reshape(B, 1, S).astype(jnp.int32)

    # Spatial axis -> (rows, 128 lanes); pad only when S is not lane aligned.
    S128 = -(-S // 128) * 128
    if S128 != S:
        x3 = jnp.pad(x3, ((0, 0), (0, 0), (0, S128 - S)))
        y3 = jnp.pad(y3, ((0, 0), (0, 0), (0, S128 - S)), constant_values=-1)
    R = S128 // 128
    x4 = x3.reshape(B, C, R, 128)
    y4 = y3.reshape(B, 1, R, 128)

    # Row tile from a combined (x + y) per-block byte budget: double-buffered,
    # this stays inside the default scoped VMEM on v5e/v6e/v7x while keeping the
    # per-step DMA much larger than the ~0.35 us grid-step overhead.  Prefer a
    # tile that divides R so no in-kernel mask is needed on the hot path.
    unit = 32
    per_row_bytes = 128 * (C * x.dtype.itemsize + 4)   # x row + int32 label row
    max_rows = max(unit, (block_bytes // per_row_bytes) // unit * unit)
    if R <= max_rows:
        rows = R
    else:
        rows = 0
        cand = max_rows
        while cand >= unit:
            if R % cand == 0:
                rows = cand
                break
            cand -= unit
        if rows == 0:
            rows = max_rows                     # partial last tile, masked in-kernel
    n_t = -(-R // rows)
    need_mask = (S128 != S) or (R % rows != 0)
    ch = 16 if C <= 8 else 8                    # vreg-sized inner row chunk

    kernel = functools.partial(_dice_stats_kernel, C=C, S=S, ROWS=rows, CH=ch,
                               gamma=gamma, apply_softmax=apply_softmax,
                               need_mask=need_mask)

    stats = pl.pallas_call(
        kernel,
        out_shape=jax.ShapeDtypeStruct((B, 4, C), jnp.float32),
        grid_spec=pltpu.PrefetchScalarGridSpec(
            num_scalar_prefetch=0,
            grid=(B, n_t),
            in_specs=[pl.BlockSpec((1, C, rows, 128), lambda b, t: (b, 0, t, 0)),
                      pl.BlockSpec((1, 1, rows, 128), lambda b, t: (b, 0, t, 0))],
            out_specs=pl.BlockSpec((1, 4, C), lambda b, t: (b, 0, 0)),
            scratch_shapes=[pltpu.VMEM((4, C, 128), jnp.float32)],
        ),
        compiler_params=pltpu.CompilerParams(
            dimension_semantics=("parallel", "arbitrary")),
    )(x4, y4)

    intersect = stats[:, 0, :]
    sum_pred = stats[:, 1, :]
    sum_gt = stats[:, 2, :]
    fn_plus_fp = stats[:, 3, :]

    # TODO(synk): loss_mask path and batch_dice + ddp AllGatherGrad branch not
    #             implemented (module defaults use neither).
    dc = (2.0 * intersect + smooth) / jnp.clip(
        sum_gt + sum_pred + smooth + fn_plus_fp, 1e-8)
    return -jnp.mean(dc)


def _reference_loss(x, y, *, smooth=1.0, gamma=2.0, apply_softmax=True):
    """Pure-JAX transcription of the PyTorch forward (defaults)."""
    xs = jax.nn.softmax(x, axis=1) if apply_softmax else x
    xs = xs.astype(jnp.float32)
    y_onehot = jax.nn.one_hot(y, x.shape[1], axis=1, dtype=jnp.float32)
    axes = tuple(range(2, x.ndim))
    intersect = jnp.sum(xs * y_onehot, axis=axes)
    sum_pred = jnp.sum(xs, axis=axes)
    sum_gt = jnp.sum(y_onehot, axis=axes)
    fn = jnp.sum((y_onehot * (1.0 - xs)) ** gamma, axis=axes)
    fp = jnp.sum(((1.0 - y_onehot) * xs) ** gamma, axis=axes)
    dc = (2.0 * intersect + smooth) / jnp.clip(
        sum_gt + sum_pred + smooth + fn + fp, 1e-8)
    return -jnp.mean(dc)


if __name__ == "__main__":
    key = jax.random.PRNGKey(0)
    kx, ky, kx2, ky2 = jax.random.split(key, 4)

    # Case 1: canonical small NCHW input, lane-aligned spatial extent.
    B, C, H, W = 2, 4, 16, 16
    x = jax.random.normal(kx, (B, C, H, W), dtype=jnp.float32)      # logits, NCHW
    y = jax.random.randint(ky, (B, H, W), 0, C, dtype=jnp.int32)    # class labels

    loss = jax.block_until_ready(
        memory_efficient_soft_dice_plus_loss(x, y, smooth=1.0, gamma=2.0,
                                             apply_softmax=True))
    ref = jax.block_until_ready(_reference_loss(x, y, smooth=1.0, gamma=2.0,
                                                apply_softmax=True))
    np.testing.assert_allclose(np.asarray(loss), np.asarray(ref),
                               rtol=1e-5, atol=1e-5)

    # Case 2: odd spatial extent (lane padding) + multi-tile grid + chunk loop,
    # forced by a small block_bytes so the tiled/masked paths are exercised.
    B2, C2, H2, W2 = 2, 3, 80, 60
    x2 = jax.random.normal(kx2, (B2, C2, H2, W2), dtype=jnp.float32)
    y2 = jax.random.randint(ky2, (B2, H2, W2), 0, C2, dtype=jnp.int32)

    loss2 = jax.block_until_ready(
        memory_efficient_soft_dice_plus_loss(x2, y2, smooth=1.0, gamma=2.0,
                                             apply_softmax=True,
                                             block_bytes=48 * 1024))
    ref2 = jax.block_until_ready(_reference_loss(x2, y2, smooth=1.0, gamma=2.0,
                                                 apply_softmax=True))
    np.testing.assert_allclose(np.asarray(loss2), np.asarray(ref2),
                               rtol=1e-5, atol=1e-5)

    print("KERNEL_OK")
</pallas_src>

<mosaic_0001>
module attributes {stable_mosaic.version = 11 : i64} {
  func.func @_dice_stats_kernel(%arg0: i32, %arg1: i32, %arg2: memref<1x4x2x128xf32, #tpu.memory_space<vmem>>, %arg3: memref<1x1x2x128xi32, #tpu.memory_space<vmem>>, %arg4: memref<1x4x4xf32, #tpu.memory_space<vmem>>, %arg5: memref<4x4x128xf32, #tpu.memory_space<vmem>>) attributes {dimension_semantics = [#tpu.dimension_semantics<parallel>, #tpu.dimension_semantics<arbitrary>], iteration_bounds = array<i64: 2, 1>, scalar_prefetch = 0 : i64, scratch_operands = 1 : i64, tpu.core_type = #tpu.core_type<tc>, window_params = [{transform_indices = @transform_0, window_bounds = array<i64: 1, 4, 2, 128>}, {transform_indices = @transform_1, window_bounds = array<i64: 1, 1, 2, 128>}, {transform_indices = @transform_2, window_bounds = array<i64: 1, 4, 4>}]} {
    %c0_i32 = arith.constant 0 : i32
    %0 = arith.cmpi eq, %arg1, %c0_i32 : i32
    %1 = arith.extui %0 : i1 to i32
    %c0_i32_0 = arith.constant 0 : i32
    %2 = arith.cmpi ne, %1, %c0_i32_0 : i32
    scf.if %2 {
      %cst_42 = arith.constant 0.000000e+00 : f32
      %86 = vector.broadcast %cst_42 : f32 to vector<4x4x128xf32>
      %c0_43 = arith.constant 0 : index
      %c0_44 = arith.constant 0 : index
      %c0_45 = arith.constant 0 : index
      %87 = vector.load %arg5[%c0_43, %c0_44, %c0_45] : memref<4x4x128xf32, #tpu.memory_space<vmem>>, vector<4x4x128xf32>
      tpu.vector_store %arg5[%c0_43, %c0_44, %c0_45], %86 {strides = array<i32>} : memref<4x4x128xf32, #tpu.memory_space<vmem>>, vector<4x4x128xf32>,
    } else {
    }
    %cst = arith.constant 0.000000e+00 : f32
    %3 = vector.broadcast %cst : f32 to vector<4x128xf32>
    %cst_1 = arith.constant 0.000000e+00 : f32
    %4 = vector.broadcast %cst_1 : f32 to vector<4x128xf32>
    %cst_2 = arith.constant 0.000000e+00 : f32
    %5 = vector.broadcast %cst_2 : f32 to vector<4x128xf32>
    %cst_3 = arith.constant 0.000000e+00 : f32
    %6 = vector.broadcast %cst_3 : f32 to vector<4x128xf32>
    %c0 = arith.constant 0 : index
    %c0_4 = arith.constant 0 : index
    %c0_5 = arith.constant 0 : index
    %c0_6 = arith.constant 0 : index
    %7 = vector.load %arg2[%c0, %c0_4, %c0_5, %c0_6] : memref<1x4x2x128xf32, #tpu.memory_space<vmem>>, vector<1x4x2x128xf32>
    %8 = vector.shape_cast %7 : vector<1x4x2x128xf32> to vector<4x2x128xf32>
    %c0_7 = arith.constant 0 : index
    %c0_8 = arith.constant 0 : index
    %c0_9 = arith.constant 0 : index
    %c0_10 = arith.constant 0 : index
    %9 = vector.load %arg3[%c0_7, %c0_8, %c0_9, %c0_10] : memref<1x1x2x128xi32, #tpu.memory_space<vmem>>, vector<1x1x2x128xi32>
    %10 = vector.shape_cast %9 : vector<1x1x2x128xi32> to vector<2x128xi32>
    %cst_11 = arith.constant dense<0xFF800000> : vector<2x128xf32>
    %11 = vector.multi_reduction <maximumf>, %8, %cst_11 [0] : vector<4x2x128xf32> to vector<2x128xf32>
    %12 = vector.shape_cast %11 : vector<2x128xf32> to vector<1x2x128xf32>
    %13 = vector.broadcast %12 : vector<1x2x128xf32> to vector<4x2x128xf32>
    %14 = arith.subf %8, %13 : vector<4x2x128xf32>
    %15 = math.exp %14 : vector<4x2x128xf32>
    %cst_12 = arith.constant dense<0.000000e+00> : vector<2x128xf32>
    %16 = vector.multi_reduction <add>, %15, %cst_12 [0] : vector<4x2x128xf32> to vector<2x128xf32>
    %17 = tpu.reciprocal %16 {approx = true} : vector<2x128xf32> -> vector<2x128xf32>
    %18 = arith.mulf %16, %17 : vector<2x128xf32>
    %cst_13 = arith.constant 2.000000e+00 : f32
    %19 = vector.broadcast %cst_13 : f32 to vector<2x128xf32>
    %20 = arith.subf %19, %18 : vector<2x128xf32>
    %21 = arith.mulf %17, %20 : vector<2x128xf32>
    %22 = vector.shape_cast %21 : vector<2x128xf32> to vector<1x2x128xf32>
    %23 = vector.broadcast %22 : vector<1x2x128xf32> to vector<4x2x128xf32>
    %24 = arith.mulf %15, %23 : vector<4x2x128xf32>
    %c0_i32_14 = arith.constant 0 : i32
    %25 = vector.broadcast %c0_i32_14 : i32 to vector<2x128xi32>
    %26 = arith.cmpi eq, %10, %25 : vector<2x128xi32>
    %27 = arith.extui %26 : vector<2x128xi1> to vector<2x128xi32>
    %28 = arith.sitofp %27 : vector<2x128xi32> to vector<2x128xf32>
    %c1_i32 = arith.constant 1 : i32
    %29 = vector.broadcast %c1_i32 : i32 to vector<2x128xi32>
    %30 = arith.cmpi eq, %10, %29 : vector<2x128xi32>
    %31 = arith.extui %30 : vector<2x128xi1> to vector<2x128xi32>
    %32 = arith.sitofp %31 : vector<2x128xi32> to vector<2x128xf32>
    %c2_i32 = arith.constant 2 : i32
    %33 = vector.broadcast %c2_i32 : i32 to vector<2x128xi32>
    %34 = arith.cmpi eq, %10, %33 : vector<2x128xi32>
    %35 = arith.extui %34 : vector<2x128xi1> to vector<2x128xi32>
    %36 = arith.sitofp %35 : vector<2x128xi32> to vector<2x128xf32>
    %c3_i32 = arith.constant 3 : i32
    %37 = vector.broadcast %c3_i32 : i32 to vector<2x128xi32>
    %38 = arith.cmpi eq, %10, %37 : vector<2x128xi32>
    %39 = arith.extui %38 : vector<2x128xi1> to vector<2x128xi32>
    %40 = arith.sitofp %39 : vector<2x128xi32> to vector<2x128xf32>
    %41 = vector.shape_cast %28 : vector<2x128xf32> to vector<1x2x128xf32>
    %42 = vector.shape_cast %32 : vector<2x128xf32> to vector<1x2x128xf32>
    %43 = vector.shape_cast %36 : vector<2x128xf32> to vector<1x2x128xf32>
    %44 = vector.shape_cast %40 : vector<2x128xf32> to vector<1x2x128xf32>
    %45 = tpu.concatenate %41, %42, %43, %44 in 0 : vector<1x2x128xf32>, vector<1x2x128xf32>, vector<1x2x128xf32>, vector<1x2x128xf32> -> vector<4x2x128xf32>
    %46 = arith.mulf %24, %45 : vector<4x2x128xf32>
    %47 = arith.subf %45, %46 : vector<4x2x128xf32>
    %48 = arith.subf %24, %46 : vector<4x2x128xf32>
    %49 = arith.addf %47, %48 : vector<4x2x128xf32>
    %50 = arith.mulf %49, %49 : vector<4x2x128xf32>
    %cst_15 = arith.constant dense<0.000000e+00> : vector<4x128xf32>
    %51 = vector.multi_reduction <add>, %46, %cst_15 [1] : vector<4x2x128xf32> to vector<4x128xf32>
    %52 = arith.addf %3, %51 : vector<4x128xf32>
    %cst_16 = arith.constant dense<0.000000e+00> : vector<4x128xf32>
    %53 = vector.multi_reduction <add>, %24, %cst_16 [1] : vector<4x2x128xf32> to vector<4x128xf32>
    %54 = arith.addf %4, %53 : vector<4x128xf32>
    %cst_17 = arith.constant dense<0.000000e+00> : vector<4x128xf32>
    %55 = vector.multi_reduction <add>, %45, %cst_17 [1] : vector<4x2x128xf32> to vector<4x128xf32>
    %56 = arith.addf %5, %55 : vector<4x128xf32>
    %cst_18 = arith.constant dense<0.000000e+00> : vector<4x128xf32>
    %57 = vector.multi_reduction <add>, %50, %cst_18 [1] : vector<4x2x128xf32> to vector<4x128xf32>
    %58 = arith.addf %6, %57 : vector<4x128xf32>
    %c0_19 = arith.constant 0 : index
    %c0_20 = arith.constant 0 : index
    %c0_21 = arith.constant 0 : index
    %59 = vector.load %arg5[%c0_19, %c0_20, %c0_21] : memref<4x4x128xf32, #tpu.memory_space<vmem>>, vector<1x4x128xf32>
    %60 = vector.shape_cast %59 : vector<1x4x128xf32> to vector<4x128xf32>
    %61 = arith.addf %60, %52 : vector<4x128xf32>
    %c0_22 = arith.constant 0 : index
    %c0_23 = arith.constant 0 : index
    %c0_24 = arith.constant 0 : index
    %62 = vector.load %arg5[%c0_22, %c0_23, %c0_24] : memref<4x4x128xf32, #tpu.memory_space<vmem>>, vector<1x4x128xf32>
    %63 = vector.shape_cast %62 : vector<1x4x128xf32> to vector<4x128xf32>
    %64 = vector.shape_cast %61 : vector<4x128xf32> to vector<1x4x128xf32>
    tpu.vector_store %arg5[%c0_22, %c0_23, %c0_24], %64 {strides = array<i32>} : memref<4x4x128xf32, #tpu.memory_space<vmem>>, vector<1x4x128xf32>,
    %c1 = arith.constant 1 : index
    %c0_25 = arith.constant 0 : index
    %c0_26 = arith.constant 0 : index
    %65 = vector.load %arg5[%c1, %c0_25, %c0_26] : memref<4x4x128xf32, #tpu.memory_space<vmem>>, vector<1x4x128xf32>
    %66 = vector.shape_cast %65 : vector<1x4x128xf32> to vector<4x128xf32>
    %67 = arith.addf %66, %54 : vector<4x128xf32>
    %c1_27 = arith.constant 1 : index
    %c0_28 = arith.constant 0 : index
    %c0_29 = arith.constant 0 : index
    %68 = vector.load %arg5[%c1_27, %c0_28, %c0_29] : memref<4x4x128xf32, #tpu.memory_space<vmem>>, vector<1x4x128xf32>
    %69 = vector.shape_cast %68 : vector<1x4x128xf32> to vector<4x128xf32>
    %70 = vector.shape_cast %67 : vector<4x128xf32> to vector<1x4x128xf32>
    tpu.vector_store %arg5[%c1_27, %c0_28, %c0_29], %70 {strides = array<i32>} : memref<4x4x128xf32, #tpu.memory_space<vmem>>, vector<1x4x128xf32>,
    %c2 = arith.constant 2 : index
    %c0_30 = arith.constant 0 : index
    %c0_31 = arith.constant 0 : index
    %71 = vector.load %arg5[%c2, %c0_30, %c0_31] : memref<4x4x128xf32, #tpu.memory_space<vmem>>, vector<1x4x128xf32>
    %72 = vector.shape_cast %71 : vector<1x4x128xf32> to vector<4x128xf32>
    %73 = arith.addf %72, %56 : vector<4x128xf32>
    %c2_32 = arith.constant 2 : index
    %c0_33 = arith.constant 0 : index
    %c0_34 = arith.constant 0 : index
    %74 = vector.load %arg5[%c2_32, %c0_33, %c0_34] : memref<4x4x128xf32, #tpu.memory_space<vmem>>, vector<1x4x128xf32>
    %75 = vector.shape_cast %74 : vector<1x4x128xf32> to vector<4x128xf32>
    %76 = vector.shape_cast %73 : vector<4x128xf32> to vector<1x4x128xf32>
    tpu.vector_store %arg5[%c2_32, %c0_33, %c0_34], %76 {strides = array<i32>} : memref<4x4x128xf32, #tpu.memory_space<vmem>>, vector<1x4x128xf32>,
    %c3 = arith.constant 3 : index
    %c0_35 = arith.constant 0 : index
    %c0_36 = arith.constant 0 : index
    %77 = vector.load %arg5[%c3, %c0_35, %c0_36] : memref<4x4x128xf32, #tpu.memory_space<vmem>>, vector<1x4x128xf32>
    %78 = vector.shape_cast %77 : vector<1x4x128xf32> to vector<4x128xf32>
    %79 = arith.addf %78, %58 : vector<4x128xf32>
    %c3_37 = arith.constant 3 : index
    %c0_38 = arith.constant 0 : index
    %c0_39 = arith.constant 0 : index
    %80 = vector.load %arg5[%c3_37, %c0_38, %c0_39] : memref<4x4x128xf32, #tpu.memory_space<vmem>>, vector<1x4x128xf32>
    %81 = vector.shape_cast %80 : vector<1x4x128xf32> to vector<4x128xf32>
    %82 = vector.shape_cast %79 : vector<4x128xf32> to vector<1x4x128xf32>
    tpu.vector_store %arg5[%c3_37, %c0_38, %c0_39], %82 {strides = array<i32>} : memref<4x4x128xf32, #tpu.memory_space<vmem>>, vector<1x4x128xf32>,
    %c0_i32_40 = arith.constant 0 : i32
    %83 = arith.cmpi eq, %arg1, %c0_i32_40 : i32
    %84 = arith.extui %83 : i1 to i32
    %c0_i32_41 = arith.constant 0 : i32
    %85 = arith.cmpi ne, %84, %c0_i32_41 : i32
    scf.if %85 {
      %c0_42 = arith.constant 0 : index
      %c0_43 = arith.constant 0 : index
      %c0_44 = arith.constant 0 : index
      %86 = vector.load %arg5[%c0_42, %c0_43, %c0_44] : memref<4x4x128xf32, #tpu.memory_space<vmem>>, vector<4x4x128xf32>
      %cst_45 = arith.constant dense<0.000000e+00> : vector<4x4xf32>
      %87 = vector.multi_reduction <add>, %86, %cst_45 [2] : vector<4x4x128xf32> to vector<4x4xf32>
      %c0_46 = arith.constant 0 : index
      %c0_47 = arith.constant 0 : index
      %c0_48 = arith.constant 0 : index
      %88 = vector.load %arg4[%c0_46, %c0_47, %c0_48] : memref<1x4x4xf32, #tpu.memory_space<vmem>>, vector<1x4x4xf32>
      %89 = vector.shape_cast %88 : vector<1x4x4xf32> to vector<4x4xf32>
      %90 = vector.shape_cast %87 : vector<4x4xf32> to vector<1x4x4xf32>
      tpu.vector_store %arg4[%c0_46, %c0_47, %c0_48], %90 {strides = array<i32>} : memref<1x4x4xf32, #tpu.memory_space<vmem>>, vector<1x4x4xf32>,
    } else {
    }
    return
  }
  func.func @transform_0(%arg0: i32, %arg1: i32) -> (i32, i32, i32, i32) {
    %c0_i32 = arith.constant 0 : i32
    %c0_i32_0 = arith.constant 0 : i32
    %c0_i32_1 = arith.constant 0 : i32
    return %arg0, %c0_i32, %arg1, %c0_i32_0 : i32, i32, i32, i32
  }
  func.func @transform_1(%arg0: i32, %arg1: i32) -> (i32, i32, i32, i32) {
    %c0_i32 = arith.constant 0 : i32
    %c0_i32_0 = arith.constant 0 : i32
    %c0_i32_1 = arith.constant 0 : i32
    return %arg0, %c0_i32, %arg1, %c0_i32_0 : i32, i32, i32, i32
  }
  func.func @transform_2(%arg0: i32, %arg1: i32) -> (i32, i32, i32) {
    %c0_i32 = arith.constant 0 : i32
    %c0_i32_0 = arith.constant 0 : i32
    %c0_i32_1 = arith.constant 0 : i32
    return %arg0, %c0_i32, %c0_i32_0 : i32, i32, i32
  }
}

</mosaic_0001>

<bundles_post_ra>
// kernel: tpu_custom_call.1
= control target key start
LH: loop header
LB: loop body
LE: loop exit
PB: predicated region body
PF: predicated region fallthrough
CT: control target
= control target key end

     0   :  { %7 = vsyncpa [#allocation4], 0  ;;  %s1178_s0 = inlined_call_operand.hbm [shape: f32[2,4,2,128], index: 0, kind: input, shape index: {}]   ;;  %s1179_s1 = inlined_call_operand.hbm [shape: s32[2,1,2,128], index: 1, kind: input, shape index: {}]   ;;  %s1180_s2 = inlined_call_operand.hbm [shape: f32[2,4,4], index: 2, kind: output, shape index: {}]  }
   0x1   :  { %9 = vsyncpa [#allocation4 + $0x1], 0 }
   0x2   :  { %10 = vsyncpa [#allocation7], 0 }
   0x3   :  { %12 = vsyncpa [#allocation7 + $0x1], 0 }
   0x4   :  { %13 = vsyncpa [#allocation5], 0 }
   0x5   :  { %15 = vsyncpa [#allocation5 + $0x1], 0  ;;  %s906_s9 = smov 0   ;;  %s908_s10 = smov 0  }
   0x6   :  { %s910_s11 = smov 0   ;;  %s912_s12 = smov 0  }
   0x7   :  { %s914_s13 = smov 0   ;;  %s916_s14 = smov 0  }
   0x8 LB: > { %s641_s15 = sadd.s32 4294967295, %s883_s14   ;;  %s642_s16 = sadd.s32 4294967294, %s883_s14   ;;  %s883_s14 = sphi %s916_s14, %s21_s14   ;;  %s879_s13 = sphi %s914_s13, %s1191_s13   ;;  %s875_s12 = sphi %s912_s12, %s1190_s12   ;;  %s871_s11 = sphi %s910_s11, %s1189_s11   ;;  %s867_s10 = sphi %s908_s10, %s1188_s10   ;;  %s863_s9 = sphi %s906_s9, %s1187_s9  }
   0x9   : > { %s33_s17 = sadd.s32 1, %s879_s13  ;;  %s42_s18 = sadd.s32 1, %s871_s11 }
   0xa   : > { %p35_p0 = scmp.ge.s32.totalorder %s33_s17, 2  ;;  %p49_p1 = scmp.ne.s32.totalorder %s871_s11, %s867_s10 }
   0xb   : > { %p50_p2 = scmp.eq.s32.totalorder %s883_s14, 0  ;;  %p55_p3 = scmp.ne.s32.totalorder %s867_s10, %s863_s9 }
   0xc   : > { %s1193_s17 = smov (%p35_p0, %s33_s17), 0  ;;  %p56_p5 = scmp.eq.s32.totalorder %s641_s15, 0 }
   0xd   : > { %p947_p4 = por %p50_p2, %p49_p1  ;;  %s37_s20 = ssub.s32 %s879_s13, %s1193_s17 }
   0xe   : > { %p107_p6 = scmp.eq.s32.totalorder %s641_s15, 1  ;;  %p40_p7 = scmp.eq.s32.totalorder %s37_s20, 0 }
   0xf   : > { %p953_p8 = por %p56_p5, %p55_p3  ;;  %p113_p10 = scmp.eq.s32.totalorder %s642_s16, 1 }
  0x10   : > { %p957_p9 = por %p107_p6, %p49_p1  ;;  %p644_p12 = scmp.ge.s32.totalorder %s883_s14, 2 }
  0x11   : > { %s962_s23 = scalar_select %p40_p7, %s871_s11, %s42_s18  }
  0x12   : > { %p964_p11 = por %p113_p10, %p55_p3  ;;  %p680_p13 = scmp.lt.s32.totalorder %s883_s14, 2 }
  0x13   : > { %s971_s25 = sand.u32 1, %s871_s11   ;;  %s662_s27 = sshll.u32 %s879_s13, 7 }
  0x14   : > { %s645_s26 = sshll.u32 %s971_s25, 3  ;;  %s144_s30 = scalar_lea.hbm %s1178_s0, %s662_s27 }
  0x15   : > { %s137_s3 = scalar_lea.vmem [#allocation3], %s645_s26  ;;  %p980_p0 = pnand %p680_p13, %p947_p4 }
  0x16   : > { %s145_s4 = sshll.u32 %s137_s3, 4  ;;  %p650_p1 = scmp.ge.s32.totalorder %s883_s14, 1  ;;  %s146_s4 = int_to_ptr.vmem [resolvable:$true] %s145_s4 }
  0x17   : > { %s134_s6 = scalar_lea.sflag [#allocation4], %s971_s25  ;;  %p745_p2 = pneg %p980_p0 }
  0x18   : > { %s756_s7 = scalar_lea.vmem %s146_s4, 128  ;;  %s885_s8 = smov [#allocation3]  }
  0x19   : > { %p757_p3 = scmp.ne.s32.totalorder %s146_s4, %s756_s7  ;;  %s761_s15 = sshll.u32 %s885_s8, 4  ;;  %s762_s15 = int_to_ptr.vmem [resolvable:$false] %s761_s15 }
  0x1a   : > { %s763_s16 = scalar_lea.vmem %s762_s15, 256  ;;  %p764_p4 = scmp.lt.s32.totalorder %s146_s4, %s762_s15 }
  0x1b   : > { %p759_p5 = pnand %p757_p3, %p745_p2  ;;  %p765_p7 = scmp.lt.s32.totalorder %s763_s16, %s756_s7 }
  0x1d   : > { %p760_p6 = pneg %p759_p5  ;;  %p766_p10 = por %p765_p7, %p764_p4 }
  0x1f   : > { %p767_p13 = pnand %p766_p10, %p760_p6 }
  0x21   : > { %770 = shalt.err (!%p767_p13)
}
  0x22   : > { %s886_s18 = smov 32   ;;  %s887_s19 = smov 2  }
  0x23   : > { %672 = dma.hbm_to_vmem [thread:$0]  (!%p980_p0), %s144_s30, 128, %s146_s4, %s134_s6, %s886_s18, %s886_s18, %s887_s19  }
  0x24   : > { %p172_p3 = scmp.lt.s32.totalorder %s883_s14, 3  ;;  %s648_s20 = sshll.u32 %s971_s25, 1 }
  0x25   : > { %s649_s26 = sshll.u32 %s879_s13, 5  ;;  %s159_s7 = scalar_lea.vmem [#allocation6], %s648_s20 }
  0x26   : > { %p998_p5 = pnand %p650_p1, %p172_p3  ;;  %s165_s3 = scalar_lea.hbm %s1179_s1, %s649_s26 }
  0x27   : > { %s167_s8 = sshll.u32 %s159_s7, 4  ;;  %s156_s15 = scalar_lea.sflag [#allocation7], %s971_s25  ;;  %s168_s8 = int_to_ptr.vmem [resolvable:$true] %s167_s8 }
  0x28   : > { %s784_s16 = scalar_lea.vmem %s168_s8, 32  ;;  %s888_s30 = smov [#allocation6]  }
  0x29   : > { %p785_p6 = scmp.ne.s32.totalorder %s168_s8, %s784_s16  ;;  %s789_s4 = sshll.u32 %s888_s30, 4  ;;  %s790_s4 = int_to_ptr.vmem [resolvable:$false] %s789_s4 }
  0x2a   : > { %s791_s6 = scalar_lea.vmem %s790_s4, 64  ;;  %p792_p1 = scmp.lt.s32.totalorder %s168_s8, %s790_s4 }
  0x2b   : > { %p787_p4 = pnand %p785_p6, %p745_p2  ;;  %p793_p10 = scmp.lt.s32.totalorder %s791_s6, %s784_s16 }
  0x2d   : > { %p788_p7 = pneg %p787_p4  ;;  %p794_p13 = por %p793_p10, %p792_p1 }
  0x2f   : > { %p795_p3 = pnand %p794_p13, %p788_p7 }
  0x31   : > { %798 = shalt.err (!%p795_p3)
}
  0x32   : > { %675 = dma.hbm_to_vmem [thread:$0]  (!%p980_p0), %s165_s3, 32, %s168_s8, %s156_s15  }
  0x33   : > { %176 = sbr.rel (%p998_p5) target bundleno = 321 (0x141), region = 28  ;;  %s1014_s25 = sand.u32 (!%p998_p5), 1, %s867_s10  }
  0x34   : > { %s651_s18 = sshll.u32 (!%p998_p5), %s1014_s25, 3  ;;  %s179_s19 = scalar_lea.sflag (!%p998_p5), [#allocation4], %s1014_s25 }
  0x35   : > { %s182_s20 = scalar_lea.vmem (!%p998_p5), [#allocation3], %s651_s18 }
  0x38   : > { %850 = dma.done.wait (%p953_p8), %s179_s19, 128  }
  0x39   : > { %852 = vsyncadd (%p953_p8), %s179_s19, 4294967168  ;;  %s652_s5 = sshll.u32 %s1014_s25, 1  ;;  %s188_s26 = scalar_lea.sflag [#allocation7], %s1014_s25 }
  0x3a   : > { %s191_s27 = scalar_lea.vmem [#allocation6], %s652_s5 }
  0x3b   : > { %854 = dma.done.wait (%p953_p8), %s188_s26, 32  }
  0x3c   : > { %856 = vsyncadd (%p953_p8), %s188_s26, 4294967264  ;;  %v889_v0 = vmov 0.0   ;;  %vm230_vm0 = vcmask 1041408   ;;  %v225_v1 = vld [vmem:[%s182_s20] sm:$0x3]  ;;  %vm430_vm5 = vcmask 1041409  }
  0x3d   : > { %221 = vst [vmem:[#allocation2] sm:$0xf] %v889_v0  ;;  %222 = vst [vmem:[#allocation2 + $0x4] sm:$0xf] %v889_v0  ;;  %v226_v2 = vld [vmem:[%s182_s20 + $0x2] sm:$0x3] }
  0x3e   : > { %223 = vst [vmem:[#allocation2 + $0x8] sm:$0xf] %v889_v0  ;;  %224 = vst [vmem:[#allocation2 + $0xc] sm:$0xf] %v889_v0  ;;  %v227_v3 = vld [vmem:[%s182_s20 + $0x4] sm:$0x3] }
  0x3f   : > { %v228_v4 = vld [vmem:[%s182_s20 + $0x6] sm:$0x3]  ;;  %v229_v5 = vld [vmem:[%s191_s27] sm:$0x3]  ;;  %v231_v6 = vsel %vm230_vm0, %v225_v1, -inf  ;;  %v232_v7 = vsel %vm230_vm0, %v226_v2, -inf }
  0x40   : > { %v233_v8 = vsel %vm230_vm0, %v227_v3, -inf  ;;  %v234_v9 = vsel %vm230_vm0, %v228_v4, -inf  ;;  %v235_v10 = vmax.f32 %v231_v6, %v232_v7  ;;  %vm265_vm1 = vcmp.eq.s32.totalorder %v229_v5, 0  ;;  %s653_s21 = sshll.u32 %s1014_s25, 2  ;;  %s659_s28 = sshll.u32 %s875_s12, 6 }
  0x41   : > { %v236_v11 = vmax.f32 %v233_v8, %v234_v9  ;;  %v1032_v12 = vsel %vm265_vm1, 1.0, %v889_v0  ;;  %vm268_vm2 = vcmp.eq.s32.totalorder %v229_v5, 1  ;;  %vm271_vm3 = vcmp.eq.s32.totalorder %v229_v5, 2  ;;  %s216_s29 = scalar_lea.vmem [#allocation8], %s653_s21  ;;  %s1135_s15 = scalar_lea.hbm %s1180_s2, %s659_s28 }
  0x42   : > { %v1034_v13 = vsel %vm268_vm2, 1.0, %v889_v0  ;;  %v1036_v14 = vsel %vm271_vm3, 1.0, %v889_v0  ;;  %vm274_vm4 = vcmp.eq.s32.totalorder %v229_v5, 3  ;;  %v361_v15 = vsel %vm230_vm0, %v1032_v12, 0.0  ;;  %s537_s3 = sshll.u32 %s216_s29, 4  ;;  %s524_s16 = scalar_lea.sflag [#allocation5], %s1014_s25  ;;  %s538_s3 = int_to_ptr.vmem [resolvable:$true] %s537_s3 }
  0x43   : > { %v237_v16 = vmax.f32 %v235_v10, %v236_v11  ;;  %v1040_v17 = vsel %vm274_vm4, 1.0, %v889_v0  ;;  %v362_v18 = vrot.slane %v361_v15, 4  ;;  %v368_v19 = vsel %vm230_vm0, %v1034_v13, 0.0  ;;  %s799_s30 = scalar_lea.vmem %s538_s3, 64  ;;  %s890_s12 = smov [#allocation8]  }
  0x44   : > { %v369_v20 = vrot.slane %v368_v19, 4  ;;  %v375_v21 = vsel %vm230_vm0, %v1036_v14, 0.0  ;;  %v382_v22 = vsel %vm230_vm0, %v1040_v17, 0.0  ;;  %vm432_vm6 = vcmask 1042434   ;;  %p800_p8 = scmp.ne.s32.totalorder %s538_s3, %s799_s30  ;;  %s803_s4 = sshll.u32 %s890_s12, 4  ;;  %s804_s4 = int_to_ptr.vmem [resolvable:$false] %s803_s4 }
  0x45   : > { %v238_v23 = vsub.f32 %v225_v1, %v237_v16  ;;  %v239_v24 = vsub.f32 %v226_v2, %v237_v16  ;;  %v240_v25 = vsub.f32 %v227_v3, %v237_v16  ;;  %v241_v26 = vsub.f32 %v228_v4, %v237_v16  ;;  %v452_v54 = vld [vmem:[#allocation2 + $0x8] sm:$0xf]  ;;  %s805_s6 = scalar_lea.vmem %s804_s4, 128  ;;  %p806_p5 = scmp.lt.s32.totalorder %s538_s3, %s804_s4 }
  0x46   : > { %v363_v27 = vadd.f32 %v362_v18, %v361_v15  ;;  %v370_v28 = vadd.f32 %v369_v20, %v368_v19  ;;  %v376_v29 = vrot.slane %v375_v21, 4  ;;  %v383_v30 = vrot.slane %v382_v22, 4  ;;  %p801_p0 = pnand %p800_p8, %p957_p9  ;;  %p807_p6 = scmp.lt.s32.totalorder %s805_s6, %s799_s30 }
  0x47   : > { %v242_v31 = vmul.f32 1.442695, %v238_v23  ;;  %v244_v32 = vmul.f32 1.442695, %v239_v24  ;;  %v246_v33 = vmul.f32 1.442695, %v240_v25 }
  0x48   : > { %v248_v34 = vmul.f32 1.442695, %v241_v26  ;;  %v364_v35 = vrot.slane %v363_v27, 2  ;;  %v371_v36 = vrot.slane %v370_v28, 2  ;;  %v377_v37 = vadd.f32 %v376_v29, %v375_v21  ;;  %p802_p2 = pneg %p801_p0  ;;  %p808_p4 = por %p807_p6, %p806_p5 }
  0x49   : > { %733 = vpow2.f32 %v242_v31  ;;  %v384_v38 = vadd.f32 %v383_v30, %v382_v22  ;;  %vm434_vm7 = vcmask 1043459   ;;  %vm482_vm8 = vcmask 1043456  }
  0x4a   : > { %735 = vpow2.f32 %v244_v32  ;;  %v365_v39 = vadd.f32 %v364_v35, %v363_v27  ;;  %v372_v40 = vadd.f32 %v371_v36, %v370_v28  ;;  %v378_v41 = vrot.slane %v377_v37, 2  ;;  %p809_p7 = pnand %p808_p4, %p802_p2 }
  0x4b   : > { %737 = vpow2.f32 %v246_v33  ;;  %v385_v42 = vrot.slane %v384_v38, 2  ;;  %vm521_vm9 = vcmask 27648  }
  0x4c   : > { %739 = vpow2.f32 %v248_v34  ;;  %v366_v43 = vrot.slane %v365_v39, 1  ;;  %v373_v44 = vrot.slane %v372_v40, 1  ;;  %v379_v45 = vadd.f32 %v378_v41, %v377_v37 }
  0x4d   : > { %v386_v46 = vadd.f32 %v385_v42, %v384_v38 }
  0x4e   : > { %v367_v47 = vadd.f32 %v366_v43, %v365_v39  ;;  %v374_v48 = vadd.f32 %v373_v44, %v372_v40  ;;  %v380_v49 = vrot.slane %v379_v45, 1 }
  0x4f   : > { %v387_v50 = vrot.slane %v386_v46, 1 }
  0x50   : > { %v381_v51 = vadd.f32 %v380_v49, %v379_v45  ;;  %v457_v52 = vsel %vm430_vm5, %v374_v48, %v367_v47 }
  0x51   : > { %v388_v53 = vadd.f32 %v387_v50, %v386_v46 }
  0x52   : > { %v458_v55 = vsel %vm432_vm6, %v381_v51, %v457_v52 }
  0x53   : > { %v459_v56 = vsel %vm434_vm7, %v388_v53, %v458_v55 }
  0x54   : > { %v461_v57 = vadd.f32 %v459_v56, %v452_v54 }
  0x56   : > { %v734_v58 = vpop.eup %733  ;;  %462 = vst [vmem:[#allocation2 + $0x8] sm:$0xf] %v461_v57 }
  0x57   : > { %v736_v59 = vpop.eup %735  ;;  %v250_v60 = vsel %vm230_vm0, %v734_v58, 0.0 }
  0x58   : > { %v738_v61 = vpop.eup %737  ;;  %v251_v62 = vsel %vm230_vm0, %v736_v59, 0.0 }
  0x59   : > { %v740_v63 = vpop.eup %739  ;;  %v252_v0 = vadd.f32 %v251_v62, %v250_v60  ;;  %v253_v1 = vsel %vm230_vm0, %v738_v61, 0.0 }
  0x5a   : > { %v255_v2 = vsel %vm230_vm0, %v740_v63, 0.0 }
  0x5b   : > { %v254_v3 = vadd.f32 %v253_v1, %v252_v0 }
  0x5d   : > { %v256_v4 = vadd.f32 %v255_v2, %v254_v3  ;;  %v480_v5 = vld [vmem:[#allocation2 + $0x8] sm:$0xf] }
  0x5e   : > { %v489_v6 = vsel %vm482_vm8, %v480_v5, 0.0 }
  0x5f   : > { %741 = vrcp.f32 %v256_v4  ;;  %490 = vadd.xlane.f32.xlu1 %v489_v6 }
  0x6c   : > { %v742_v7 = vpop.eup %741 }
  0x6d   : > { %v258_v8 = vmul.f32 %v742_v7, %v256_v4 }
  0x6f   : > { %v259_v9 = vsub.f32 2.0, %v258_v8 }
  0x71   : > { %v260_v10 = vmul.f32 %v742_v7, %v259_v9 }
  0x73   : > { %v1056_v11 = vmul.f32 %v734_v58, %v260_v10  ;;  %v1058_v15 = vmul.f32 %v736_v59, %v260_v10  ;;  %v1060_v16 = vmul.f32 %v738_v61, %v260_v10  ;;  %v1062_v18 = vmul.f32 %v740_v63, %v260_v10 }
  0x75   : > { %v1066_v19 = vmul.f32 %v1032_v12, %v1056_v11  ;;  %v1070_v20 = vmul.f32 %v1034_v13, %v1058_v15  ;;  %v1074_v21 = vmul.f32 %v1036_v14, %v1060_v16  ;;  %v1078_v22 = vmul.f32 %v1040_v17, %v1062_v18 }
  0x76   : > { %v329_v23 = vsel %vm230_vm0, %v1056_v11, 0.0  ;;  %v336_v24 = vsel %vm230_vm0, %v1058_v15, 0.0  ;;  %v343_v25 = vsel %vm230_vm0, %v1060_v16, 0.0  ;;  %v350_v26 = vsel %vm230_vm0, %v1062_v18, 0.0 }
  0x77   : > { %v297_v27 = vsel %vm230_vm0, %v1066_v19, 0.0  ;;  %v304_v28 = vsel %vm230_vm0, %v1070_v20, 0.0  ;;  %v311_v29 = vsel %vm230_vm0, %v1074_v21, 0.0  ;;  %v318_v30 = vsel %vm230_vm0, %v1078_v22, 0.0 }
  0x78   : > { %v298_v31 = vrot.slane %v297_v27, 4  ;;  %v305_v32 = vrot.slane %v304_v28, 4  ;;  %v312_v33 = vrot.slane %v311_v29, 4  ;;  %v319_v34 = vrot.slane %v318_v30, 4 }
  0x79   : > { %v330_v35 = vrot.slane %v329_v23, 4  ;;  %v337_v36 = vrot.slane %v336_v24, 4  ;;  %v344_v37 = vrot.slane %v343_v25, 4  ;;  %v351_v38 = vrot.slane %v350_v26, 4 }
  0x7a   : > { %v299_v39 = vadd.f32 %v298_v31, %v297_v27  ;;  %v306_v40 = vadd.f32 %v305_v32, %v304_v28  ;;  %v313_v41 = vadd.f32 %v312_v33, %v311_v29  ;;  %v320_v42 = vadd.f32 %v319_v34, %v318_v30  ;;  %v425_v27 = vld [vmem:[#allocation2] sm:$0xf]  ;;  %v440_v33 = vld [vmem:[#allocation2 + $0x4] sm:$0xf] }
  0x7b   : > { %v331_v43 = vadd.f32 %v330_v35, %v329_v23  ;;  %v338_v44 = vadd.f32 %v337_v36, %v336_v24  ;;  %v345_v45 = vadd.f32 %v344_v37, %v343_v25  ;;  %v352_v46 = vadd.f32 %v351_v38, %v350_v26 }
  0x7c   : > { %v300_v47 = vrot.slane %v299_v39, 2  ;;  %v307_v48 = vrot.slane %v306_v40, 2  ;;  %v314_v49 = vrot.slane %v313_v41, 2  ;;  %v321_v50 = vrot.slane %v320_v42, 2 }
  0x7d   : > { %v332_v51 = vrot.slane %v331_v43, 2  ;;  %v339_v52 = vrot.slane %v338_v44, 2  ;;  %v346_v53 = vrot.slane %v345_v45, 2  ;;  %v353_v54 = vrot.slane %v352_v46, 2 }
  0x7e   : > { %v301_v55 = vadd.f32 %v300_v47, %v299_v39  ;;  %v308_v56 = vadd.f32 %v307_v48, %v306_v40  ;;  %v315_v57 = vadd.f32 %v314_v49, %v313_v41  ;;  %v322_v58 = vadd.f32 %v321_v50, %v320_v42 }
  0x7f   : > { %v333_v59 = vadd.f32 %v332_v51, %v331_v43  ;;  %v340_v60 = vadd.f32 %v339_v52, %v338_v44  ;;  %v347_v61 = vadd.f32 %v346_v53, %v345_v45  ;;  %v354_v62 = vadd.f32 %v353_v54, %v352_v46 }
  0x80   : > { %v302_v63 = vrot.slane %v301_v55, 1  ;;  %v309_v0 = vrot.slane %v308_v56, 1  ;;  %v316_v1 = vrot.slane %v315_v57, 1  ;;  %v323_v2 = vrot.slane %v322_v58, 1 }
  0x81   : > { %v334_v3 = vrot.slane %v333_v59, 1  ;;  %v341_v4 = vrot.slane %v340_v60, 1  ;;  %v348_v5 = vrot.slane %v347_v61, 1  ;;  %v355_v6 = vrot.slane %v354_v62, 1 }
  0x82   : > { %v303_v7 = vadd.f32 %v302_v63, %v301_v55  ;;  %v310_v8 = vadd.f32 %v309_v0, %v308_v56  ;;  %v317_v9 = vadd.f32 %v316_v1, %v315_v57  ;;  %v324_v10 = vadd.f32 %v323_v2, %v322_v58 }
  0x83   : > { %v335_v23 = vadd.f32 %v334_v3, %v333_v59  ;;  %v342_v24 = vadd.f32 %v341_v4, %v340_v60  ;;  %v349_v25 = vadd.f32 %v348_v5, %v347_v61  ;;  %v356_v26 = vadd.f32 %v355_v6, %v354_v62 }
  0x84   : > { %v431_v28 = vsel %vm430_vm5, %v310_v8, %v303_v7  ;;  %v281_v29 = vsub.f32 %v1032_v12, %v1066_v19  ;;  %v282_v30 = vsub.f32 %v1034_v13, %v1070_v20  ;;  %v283_v31 = vsub.f32 %v1036_v14, %v1074_v21 }
  0x85   : > { %v433_v32 = vsel %vm432_vm6, %v317_v9, %v431_v28  ;;  %v445_v34 = vsel %vm430_vm5, %v342_v24, %v335_v23  ;;  %v284_v35 = vsub.f32 %v1040_v17, %v1078_v22  ;;  %v285_v36 = vsub.f32 %v1056_v11, %v1066_v19  ;;  %v464_v9 = vld [vmem:[#allocation2 + $0xc] sm:$0xf] }
  0x86   : > { %v435_v37 = vsel %vm434_vm7, %v324_v10, %v433_v32  ;;  %v446_v12 = vsel %vm432_vm6, %v349_v25, %v445_v34  ;;  %v286_v13 = vsub.f32 %v1058_v15, %v1070_v20  ;;  %v287_v14 = vsub.f32 %v1060_v16, %v1074_v21 }
  0x87   : > { %v437_v38 = vadd.f32 %v435_v37, %v425_v27  ;;  %v447_v39 = vsel %vm434_vm7, %v356_v26, %v446_v12  ;;  %v288_v40 = vsub.f32 %v1062_v18, %v1078_v22  ;;  %v289_v17 = vadd.f32 %v285_v36, %v281_v29 }
  0x88   : > { %v449_v41 = vadd.f32 %v447_v39, %v440_v33  ;;  %v290_v42 = vadd.f32 %v286_v13, %v282_v30  ;;  %v291_v11 = vadd.f32 %v287_v14, %v283_v31  ;;  %v499_v28 = vlaneseq }
  0x89   : > { %438 = vst [vmem:[#allocation2] sm:$0xf] %v437_v38  ;;  %v292_v19 = vadd.f32 %v288_v40, %v284_v35  ;;  %v293_v43 = vmul.f32 %v289_v17, %v289_v17 }
  0x8a   : > { %450 = vst [vmem:[#allocation2 + $0x4] sm:$0xf] %v449_v41  ;;  %v294_v44 = vmul.f32 %v290_v42, %v290_v42  ;;  %v295_v45 = vmul.f32 %v291_v11, %v291_v11  ;;  %v500_v30 = vand.u32 127, %v499_v28  ;;  %v502_v31 = vshrl.u32 %v499_v28, 7 }
  0x8b   : > { %v296_v15 = vmul.f32 %v292_v19, %v292_v19  ;;  %v393_v20 = vsel %vm230_vm0, %v293_v43, 0.0 }
  0x8c   : > { %v394_v16 = vrot.slane %v393_v20, 4  ;;  %v400_v21 = vsel %vm230_vm0, %v294_v44, 0.0  ;;  %v407_v46 = vsel %vm230_vm0, %v295_v45, 0.0  ;;  %v503_v33 = vsub.s32 %v500_v30, %v502_v31 }
  0x8d   : > { %v401_v47 = vrot.slane %v400_v21, 4  ;;  %v408_v18 = vrot.slane %v407_v46, 4  ;;  %v414_v22 = vsel %vm230_vm0, %v296_v15, 0.0 }
  0x8e   : > { %v395_v48 = vadd.f32 %v394_v16, %v393_v20  ;;  %v415_v49 = vrot.slane %v414_v22, 4 }
  0x8f   : > { %v402_v50 = vadd.f32 %v401_v47, %v400_v21  ;;  %v409_v51 = vadd.f32 %v408_v18, %v407_v46 }
  0x90   : > { %v478_v52 = vld [vmem:[#allocation2] sm:$0xf]  ;;  %v396_v53 = vrot.slane %v395_v48, 2  ;;  %v416_v54 = vadd.f32 %v415_v49, %v414_v22 }
  0x91   : > { %v483_v55 = vsel %vm482_vm8, %v478_v52, 0.0  ;;  %v479_v56 = vld [vmem:[#allocation2 + $0x4] sm:$0xf]  ;;  %v403_v57 = vrot.slane %v402_v50, 2  ;;  %v410_v58 = vrot.slane %v409_v51, 2 }
  0x92   : > { %484 = vadd.xlane.f32.xlu0 %v483_v55  ;;  %v397_v59 = vadd.f32 %v396_v53, %v395_v48  ;;  %v417_v60 = vrot.slane %v416_v54, 2  ;;  %v486_v61 = vsel %vm482_vm8, %v479_v56, 0.0 }
  0x93   : > { %v404_v62 = vadd.f32 %v403_v57, %v402_v50  ;;  %v411_v63 = vadd.f32 %v410_v58, %v409_v51 }
  0x94   : > { %v398_v0 = vrot.slane %v397_v59, 1  ;;  %v418_v1 = vadd.f32 %v417_v60, %v416_v54 }
  0x95   : > { %v405_v2 = vrot.slane %v404_v62, 1  ;;  %v412_v3 = vrot.slane %v411_v63, 1 }
  0x96   : > { %487 = vadd.xlane.f32.xlu0 %v486_v61  ;;  %v399_v4 = vadd.f32 %v398_v0, %v397_v59  ;;  %v419_v5 = vrot.slane %v418_v1, 1 }
  0x97   : > { %v406_v6 = vadd.f32 %v405_v2, %v404_v62  ;;  %v413_v7 = vadd.f32 %v412_v3, %v411_v63 }
  0x98   : > { %v420_v8 = vadd.f32 %v419_v5, %v418_v1 }
  0x99   : > { %v469_v10 = vsel %vm430_vm5, %v406_v6, %v399_v4 }
  0x9a   : > { %v470_v23 = vsel %vm432_vm6, %v413_v7, %v469_v10 }
  0x9b   : > { %v471_v24 = vsel %vm434_vm7, %v420_v8, %v470_v23 }
  0x9c   : > { %v473_v25 = vadd.f32 %v471_v24, %v464_v9 }
  0x9e   : > { %474 = vst [vmem:[#allocation2 + $0xc] sm:$0xf] %v473_v25 }
  0xa5   : > { %v481_v26 = vld [vmem:[#allocation2 + $0xc] sm:$0xf] }
  0xa6   : > { %v492_v27 = vsel %vm482_vm8, %v481_v26, 0.0 }
  0xa7   : > { %493 = vadd.xlane.f32.xlu1 %v492_v27 }
  0xe8   : > { %v491_v35 = vpop.xlane.xlu1 %490 }
  0xe9   : > { %v512_v12 = vrot.slane %v491_v35, %v503_v33 }
 0x11b   : > { %v485_v29 = vpop.xlane.xlu0 %484 }
 0x11c   : > { %v504_v36 = vrot.slane %v485_v29, %v503_v33 }
 0x11f   : > { %v488_v32 = vpop.xlane.xlu0 %487 }
 0x120   : > { %v508_v34 = vrot.slane %v488_v32, %v503_v33 }
 0x122   : > { %v517_v37 = vsel %vm430_vm5, %v508_v34, %v504_v36 }
 0x123   : > { %v518_v14 = vsel %vm432_vm6, %v512_v12, %v517_v37 }
 0x130   : > { %v494_v13 = vpop.xlane.xlu1 %493 }
 0x131   : > { %v516_v38 = vrot.slane %v494_v13, %v503_v33 }
 0x133   : > { %v519_v39 = vsel %vm434_vm7, %v516_v38, %v518_v14 }
 0x134   : > { %522 = vst.msk [vmem:[%s216_s29] sm:$0xf] %vm521_vm9, %v519_v39 }
 0x135   : > { %812 = shalt.err (!%p809_p7)
}
 0x136   : > { %s813_s18 = scalar_lea.hbm %s1135_s15, 64  ;;  %s817_s20 = scalar_lea.hbm %s1180_s2, 128 }
 0x137   : > { %p814_p1 = scmp.ne.s32.totalorder %s1135_s15, %s813_s18  ;;  %p818_p3 = scmp.lt.s32.totalorder %s1135_s15, %s1180_s2 }
 0x138   : > { %p819_p8 = scmp.lt.s32.totalorder %s817_s20, %s813_s18 }
 0x139   : > { %p815_p10 = pnand %p814_p1, %p957_p9 }
 0x13a   : > { %p820_p0 = por %p819_p8, %p818_p3 }
 0x13b   : > { %p816_p13 = pneg %p815_p10 }
 0x13d   : > { %p821_p2 = pnand %p820_p0, %p816_p13 }
 0x13f   : > { %824 = shalt.err (!%p821_p2)
}
 0x140   : > { %667 = dma.vmem_to_hbm [thread:$0]  (%p957_p9), %s538_s3, 64, %s1135_s15, %s524_s16  }
 0x141 PF: > { %s549_s27 = sand.u32 1, %s863_s9   ;;  %p677_p5 = pnand %p644_p12, %p964_p11 }
 0x142   : > { %s550_s21 = scalar_lea.sflag [#allocation5], %s549_s27 }
 0x143   : > { %p678_p6 = pneg %p677_p5 }
 0x145   : > { %858 = dma.done.wait (%p678_p6), %s550_s21, 64  }
 0x146   : > { %860 = vsyncadd (%p678_p6), %s550_s21, 4294967232  ;;  %s21_s14 = sadd.s32 1, %s883_s14   ;;  %s1187_s9 = smov %s867_s10 }
 0x147   : > { %p18_p4 = scmp.ge.s32.totalorder %s21_s14, 4   ;;  %s1188_s10 = smov %s871_s11 }
 0x148   : > { %s1189_s11 = smov %s962_s23  ;;  %s1190_s12 = smov %s879_s13 }
 0x149   : > { %s1191_s13 = smov %s1193_s17  ;;  %20 = sbr.rel (!%p18_p4) target bundleno = 8 (0x8), region = 97 }
 0x14e   :  { %555 = vsyncpa [#allocation4], 1 }
 0x14f   :  { %557 = vsyncpa [#allocation4 + $0x1], 1 }
 0x150   :  { %558 = vsyncpa [#allocation7], 1 }
 0x151   :  { %560 = vsyncpa [#allocation7 + $0x1], 1 }
 0x152   :  { %561 = vsyncpa [#allocation5], 1 }
 0x153   :  { %563 = vsyncpa [#allocation5 + $0x1], 1 }

</bundles_post_ra>
